<compile_context>
chip_gen: v5e
topology: v5e:2x2
jax: 0.10.0
libtpu: 0.0.40
codegen_flags: <defaults>
</compile_context>

<pallas_src>
import jax
import jax.numpy as jnp
from jax.experimental import pallas as pl
from jax.experimental.pallas import tpu as pltpu


# ----------------------------------------------------------------------------- kernels


def _ffn_resident_kernel(x_ref, w1_ref, b1_ref, w2_ref, b2_ref, o_ref):
    # x_ref: (TM, H), w1_ref: (H, P), b1_ref: (1, P), w2_ref: (P, H), b2_ref: (1, H)
    x = x_ref[...]
    h = jnp.dot(x, w1_ref[...], preferred_element_type=jnp.float32)
    h = jnp.maximum(h + b1_ref[...].astype(jnp.float32), 0.0)
    # TODO(synk): dropout is identity in eval mode; training-mode dropout would need
    #             pltpu.prng_seed / pltpu.prng_random_bits masking.
    out = jnp.dot(h.astype(w2_ref.dtype), w2_ref[...],
                  preferred_element_type=jnp.float32)
    out = out + b2_ref[...].astype(jnp.float32)
    o_ref[...] = out.astype(o_ref.dtype)


def _ffn_ptiled_kernel(x_ref, w1_ref, b1_ref, w2_ref, b2_ref, o_ref, acc_ref):
    # Grid = (m, p); p is a reduction over pf_dim chunks.
    # x_ref: (TM, H), w1_ref: (H, TP), b1_ref: (1, TP), w2_ref: (TP, H),
    # b2_ref: (1, H), acc_ref: (TM, H) f32 scratch.
    p = pl.program_id(1)

    @pl.when(p == 0)
    def _():
        acc_ref[...] = jnp.zeros_like(acc_ref)

    h = jnp.dot(x_ref[...], w1_ref[...], preferred_element_type=jnp.float32)
    h = jnp.maximum(h + b1_ref[...].astype(jnp.float32), 0.0)
    acc_ref[...] += jnp.dot(h.astype(w2_ref.dtype), w2_ref[...],
                            preferred_element_type=jnp.float32)

    @pl.when(p == pl.num_programs(1) - 1)
    def _():
        o_ref[...] = (acc_ref[...] + b2_ref[...].astype(jnp.float32)).astype(o_ref.dtype)


# ----------------------------------------------------------------------------- helpers


def _round_up(v, m):
    return ((v + m - 1) // m) * m


def _vmem_capacity_bytes():
    """Per-TensorCore VMEM capacity; conservative (v7x) default if unavailable."""
    try:
        info = pltpu.get_tpu_info()
        cap = getattr(info, "vmem_capacity_bytes", None)
        if cap:
            return int(cap)
    except Exception:
        pass
    return 64 << 20


def _spec(shape, index_map, nbuf=None):
    """BlockSpec; optionally request an explicit pipeline buffer count."""
    if nbuf is not None:
        try:
            return pl.BlockSpec(shape, index_map, pipeline_mode=pl.Buffered(nbuf))
        except Exception:
            pass  # older jax without pipeline_mode -> default double buffering
    return pl.BlockSpec(shape, index_map)


# ----------------------------------------------------------------------------- wrapper


def feed_forward(x, w1, b1, w2, b2, *, tm_max=None, tp=512,
                 compute_dtype=None, force_p_tiled=False):
    """x: [..., hid_dim] -> [..., hid_dim].  w1: [hid_dim, pf_dim], w2: [pf_dim, hid_dim]."""
    orig_shape = x.shape
    out_dtype = x.dtype
    hid_dim = orig_shape[-1]
    pf_dim = w1.shape[1]

    # Optional mixed precision: bf16 MXU inputs with f32 accumulation.
    if compute_dtype is not None:
        x = x.astype(compute_dtype)
        w1 = w1.astype(compute_dtype)
        w2 = w2.astype(compute_dtype)

    x2d = x.reshape(-1, hid_dim)
    M = x2d.shape[0]

    x_bytes = jnp.dtype(x.dtype).itemsize
    w_bytes = jnp.dtype(w1.dtype).itemsize
    o_bytes = jnp.dtype(out_dtype).itemsize

    cap = _vmem_capacity_bytes()

    # Token tile: big on 128 MiB parts, conservative on 64 MiB (v7x); no M padding,
    # grid = cdiv(M, TM) and Pallas clips the ragged last tile.
    if tm_max is None:
        tm_max = 512 if cap >= (100 << 20) else 256
    if M >= tm_max:
        TM = tm_max                      # multiple of 128 -> fully occupied MXU passes
    elif M >= 128:
        TM = (M // 128) * 128            # 128-aligned, never larger than M
    else:
        TM = M                           # single block equal to the full row extent
    grid_m = pl.cdiv(M, TM)

    # Lane-dense feature dims (no-op padding for real ViViT dims 768 / 3072).
    H_pad = _round_up(hid_dim, 128)
    P_pad128 = _round_up(pf_dim, 128)

    # Resident-weights plan (single-buffered): does it fit comfortably in VMEM?
    resident_w_bytes = (2 * H_pad * P_pad128 + P_pad128 + H_pad) * w_bytes
    use_resident = (not force_p_tiled) and (resident_w_bytes <= int(0.55 * cap))

    xp = x2d if H_pad == hid_dim else jnp.pad(x2d, ((0, 0), (0, H_pad - hid_dim)))

    def _clamp_vmem(est):
        return int(max(min(max(est, 32 << 20), cap - (8 << 20)), 16 << 20))

    if use_resident:
        P_pad = P_pad128
        w1p = jnp.pad(w1, ((0, H_pad - hid_dim), (0, P_pad - pf_dim)))
        b1p = jnp.pad(b1, ((0, P_pad - pf_dim),)).reshape(1, P_pad)
        w2p = jnp.pad(w2, ((0, P_pad - pf_dim), (0, H_pad - hid_dim)))
        b2p = jnp.pad(b2, ((0, H_pad - hid_dim),)).reshape(1, H_pad)

        vmem_est = ((2 * H_pad * P_pad + P_pad + H_pad) * w_bytes      # weights x1 (Buffered(1))
                    + 2 * TM * H_pad * (x_bytes + o_bytes)             # double-buffered x / out
                    + TM * P_pad * (4 + w_bytes)                       # f32 h + cast copy
                    + (8 << 20))                                       # Mosaic scratch margin
        cost = pl.CostEstimate(
            flops=4 * M * H_pad * P_pad,
            transcendentals=0,
            bytes_accessed=(M * H_pad * (x_bytes + o_bytes)
                            + (w1p.size + b1p.size + w2p.size + b2p.size) * w_bytes))

        out = pl.pallas_call(
            _ffn_resident_kernel,
            out_shape=jax.ShapeDtypeStruct((M, H_pad), out_dtype),
            grid_spec=pltpu.PrefetchScalarGridSpec(
                num_scalar_prefetch=0,
                grid=(grid_m,),
                in_specs=[
                    _spec((TM, H_pad), lambda i: (i, 0)),               # x tile (pipelined)
                    _spec((H_pad, P_pad), lambda i: (0, 0), nbuf=1),    # w1 resident, x1 buffer
                    _spec((1, P_pad), lambda i: (0, 0), nbuf=1),        # b1
                    _spec((P_pad, H_pad), lambda i: (0, 0), nbuf=1),    # w2
                    _spec((1, H_pad), lambda i: (0, 0), nbuf=1),        # b2
                ],
                out_specs=pl.BlockSpec((TM, H_pad), lambda i: (i, 0)),
            ),
            compiler_params=pltpu.CompilerParams(
                dimension_semantics=("parallel",),
                vmem_limit_bytes=_clamp_vmem(vmem_est),
            ),
            cost_estimate=cost,
        )(xp, w1p, b1p, w2p, b2p)
    else:
        # P-tiled fallback: stream pf_dim chunks, accumulate fc2 in f32 scratch.
        TP = min(_round_up(tp, 128), P_pad128)
        P_pad = _round_up(pf_dim, TP)
        grid_p = P_pad // TP

        w1p = jnp.pad(w1, ((0, H_pad - hid_dim), (0, P_pad - pf_dim)))
        b1p = jnp.pad(b1, ((0, P_pad - pf_dim),)).reshape(1, P_pad)
        w2p = jnp.pad(w2, ((0, P_pad - pf_dim), (0, H_pad - hid_dim)))
        b2p = jnp.pad(b2, ((0, H_pad - hid_dim),)).reshape(1, H_pad)

        vmem_est = (2 * (2 * H_pad * TP + TP) * w_bytes                 # streamed w1/w2/b1 chunks
                    + H_pad * w_bytes                                   # b2
                    + 2 * TM * H_pad * (x_bytes + o_bytes)              # x / out tiles
                    + TM * H_pad * 4                                    # f32 accumulator
                    + TM * TP * (4 + w_bytes)                           # f32 h chunk + cast
                    + (8 << 20))
        cost = pl.CostEstimate(
            flops=4 * M * H_pad * P_pad,
            transcendentals=0,
            bytes_accessed=(M * H_pad * (x_bytes + o_bytes)
                            + grid_m * (w1p.size + b1p.size + w2p.size) * w_bytes
                            + b2p.size * w_bytes))

        out = pl.pallas_call(
            _ffn_ptiled_kernel,
            out_shape=jax.ShapeDtypeStruct((M, H_pad), out_dtype),
            grid_spec=pltpu.PrefetchScalarGridSpec(
                num_scalar_prefetch=0,
                grid=(grid_m, grid_p),
                in_specs=[
                    _spec((TM, H_pad), lambda i, p: (i, 0)),            # x tile (constant over p)
                    _spec((H_pad, TP), lambda i, p: (0, p)),            # w1 chunk
                    _spec((1, TP), lambda i, p: (0, p)),                # b1 chunk
                    _spec((TP, H_pad), lambda i, p: (p, 0)),            # w2 chunk
                    _spec((1, H_pad), lambda i, p: (0, 0), nbuf=1),     # b2 resident
                ],
                out_specs=pl.BlockSpec((TM, H_pad), lambda i, p: (i, 0)),
                scratch_shapes=[pltpu.VMEM((TM, H_pad), jnp.float32)],
            ),
            compiler_params=pltpu.CompilerParams(
                dimension_semantics=("parallel", "arbitrary"),
                vmem_limit_bytes=_clamp_vmem(vmem_est),
            ),
            cost_estimate=cost,
        )(xp, w1p, b1p, w2p, b2p)

    return out[:, :hid_dim].reshape(orig_shape)


# ----------------------------------------------------------------------------- reference / test


def _reference(x, w1, b1, w2, b2):
    hp = jax.lax.Precision.HIGHEST
    h = jnp.maximum(jnp.dot(x, w1, precision=hp) + b1, 0.0)
    return jnp.dot(h, w2, precision=hp) + b2


def _make_params(key, hid_dim, pf_dim):
    k1, k2, k3, k4 = jax.random.split(key, 4)
    bound1 = 1.0 / (hid_dim ** 0.5)
    bound2 = 1.0 / (pf_dim ** 0.5)
    w1 = jax.random.uniform(k1, (hid_dim, pf_dim), jnp.float32, -bound1, bound1)
    b1 = jax.random.uniform(k2, (pf_dim,), jnp.float32, -bound1, bound1)
    w2 = jax.random.uniform(k3, (pf_dim, hid_dim), jnp.float32, -bound2, bound2)
    b2 = jax.random.uniform(k4, (hid_dim,), jnp.float32, -bound2, bound2)
    return w1, b1, w2, b2


if __name__ == "__main__":
    key = jax.random.PRNGKey(0)
    kx, kp, kx2, kx3, kp3 = jax.random.split(key, 5)

    batch, seq, hid_dim, pf_dim = 2, 8, 32, 64
    x = jax.random.normal(kx, (batch, seq, hid_dim), dtype=jnp.float32)
    w1, b1, w2, b2 = _make_params(kp, hid_dim, pf_dim)

    # 1) Resident-weights path, f32.
    out = feed_forward(x, w1, b1, w2, b2)
    jax.block_until_ready(out)
    ref = _reference(x, w1, b1, w2, b2)
    assert out.shape == x.shape
    assert jnp.allclose(out, ref, atol=2e-2, rtol=2e-2)

    # 2) M not divisible by the tile size -> ragged last tile (no M padding), grid > 1.
    x2 = jax.random.normal(kx2, (3, 50, hid_dim), dtype=jnp.float32)
    out2 = feed_forward(x2, w1, b1, w2, b2, tm_max=64)
    jax.block_until_ready(out2)
    ref2 = _reference(x2, w1, b1, w2, b2)
    assert out2.shape == x2.shape
    assert jnp.allclose(out2, ref2, atol=2e-2, rtol=2e-2)

    # 3) Forced P-tiled fallback path (pf_dim split into 2 chunks, f32 accumulator).
    hid3, pf3 = 32, 256
    x3 = jax.random.normal(kx3, (2, 16, hid3), dtype=jnp.float32)
    w1c, b1c, w2c, b2c = _make_params(kp3, hid3, pf3)
    out3 = feed_forward(x3, w1c, b1c, w2c, b2c, force_p_tiled=True, tp=128)
    jax.block_until_ready(out3)
    ref3 = _reference(x3, w1c, b1c, w2c, b2c)
    assert out3.shape == x3.shape
    assert jnp.allclose(out3, ref3, atol=2e-2, rtol=2e-2)

    # 4) bf16 inputs/weights with f32 accumulation (perf path; looser tolerance).
    out4 = feed_forward(x, w1, b1, w2, b2, compute_dtype=jnp.bfloat16)
    jax.block_until_ready(out4)
    assert out4.shape == x.shape and out4.dtype == x.dtype
    assert jnp.allclose(out4, ref, atol=1e-1, rtol=1e-1)

    print("KERNEL_OK")
</pallas_src>

<mosaic_0001>
module attributes {stable_mosaic.version = 11 : i64} {
  func.func @_ffn_resident_kernel(%arg0: i32, %arg1: memref<16x128xf32, #tpu.memory_space<vmem>>, %arg2: memref<128x128xf32, #tpu.memory_space<vmem>>, %arg3: memref<1x128xf32, #tpu.memory_space<vmem>>, %arg4: memref<128x128xf32, #tpu.memory_space<vmem>>, %arg5: memref<1x128xf32, #tpu.memory_space<vmem>>, %arg6: memref<16x128xf32, #tpu.memory_space<vmem>>) attributes {dimension_semantics = [#tpu.dimension_semantics<parallel>], iteration_bounds = array<i64: 1>, scalar_prefetch = 0 : i64, scratch_operands = 0 : i64, tpu.core_type = #tpu.core_type<tc>, window_params = [{transform_indices = @transform_0, window_bounds = array<i64: 16, 128>}, {pipeline_mode = #tpu.pipeline_mode<synchronous>, transform_indices = @transform_1, window_bounds = array<i64: 128, 128>}, {pipeline_mode = #tpu.pipeline_mode<synchronous>, transform_indices = @transform_2, window_bounds = array<i64: 1, 128>}, {pipeline_mode = #tpu.pipeline_mode<synchronous>, transform_indices = @transform_3, window_bounds = array<i64: 128, 128>}, {pipeline_mode = #tpu.pipeline_mode<synchronous>, transform_indices = @transform_4, window_bounds = array<i64: 1, 128>}, {transform_indices = @transform_5, window_bounds = array<i64: 16, 128>}]} {
    %c0 = arith.constant 0 : index
    %c0_0 = arith.constant 0 : index
    %0 = vector.load %arg1[%c0, %c0_0] : memref<16x128xf32, #tpu.memory_space<vmem>>, vector<16x128xf32>
    %c0_1 = arith.constant 0 : index
    %c0_2 = arith.constant 0 : index
    %1 = vector.load %arg2[%c0_1, %c0_2] : memref<128x128xf32, #tpu.memory_space<vmem>>, vector<128x128xf32>
    %cst = arith.constant dense<0.000000e+00> : vector<16x128xf32>
    %2 = tpu.matmul %0, %1, %cst {dimension_numbers = #tpu.dot_dimension_numbers<[1], [0], [0], [1], [0, 0, 1, 1], [], []>} : vector<16x128xf32>, vector<128x128xf32>, vector<16x128xf32> -> vector<16x128xf32>
    %c0_3 = arith.constant 0 : index
    %c0_4 = arith.constant 0 : index
    %3 = vector.load %arg3[%c0_3, %c0_4] : memref<1x128xf32, #tpu.memory_space<vmem>>, vector<1x128xf32>
    %4 = vector.broadcast %3 : vector<1x128xf32> to vector<16x128xf32>
    %5 = arith.addf %2, %4 : vector<16x128xf32>
    %cst_5 = arith.constant 0.000000e+00 : f32
    %6 = vector.broadcast %cst_5 : f32 to vector<16x128xf32>
    %7 = arith.maximumf %5, %6 : vector<16x128xf32>
    %c0_6 = arith.constant 0 : index
    %c0_7 = arith.constant 0 : index
    %8 = vector.load %arg4[%c0_6, %c0_7] : memref<128x128xf32, #tpu.memory_space<vmem>>, vector<128x128xf32>
    %cst_8 = arith.constant dense<0.000000e+00> : vector<16x128xf32>
    %9 = tpu.matmul %7, %8, %cst_8 {dimension_numbers = #tpu.dot_dimension_numbers<[1], [0], [0], [1], [0, 0, 1, 1], [], []>} : vector<16x128xf32>, vector<128x128xf32>, vector<16x128xf32> -> vector<16x128xf32>
    %c0_9 = arith.constant 0 : index
    %c0_10 = arith.constant 0 : index
    %10 = vector.load %arg5[%c0_9, %c0_10] : memref<1x128xf32, #tpu.memory_space<vmem>>, vector<1x128xf32>
    %11 = vector.broadcast %10 : vector<1x128xf32> to vector<16x128xf32>
    %12 = arith.addf %9, %11 : vector<16x128xf32>
    %c0_11 = arith.constant 0 : index
    %c0_12 = arith.constant 0 : index
    %13 = vector.load %arg6[%c0_11, %c0_12] : memref<16x128xf32, #tpu.memory_space<vmem>>, vector<16x128xf32>
    tpu.vector_store %arg6[%c0_11, %c0_12], %12 {strides = array<i32>} : memref<16x128xf32, #tpu.memory_space<vmem>>, vector<16x128xf32>,
    return
  }
  func.func @transform_0(%arg0: i32) -> (i32, i32) {
    %c0_i32 = arith.constant 0 : i32
    %c0_i32_0 = arith.constant 0 : i32
    return %arg0, %c0_i32 : i32, i32
  }
  func.func @transform_1(%arg0: i32) -> (i32, i32) {
    %c0_i32 = arith.constant 0 : i32
    %c0_i32_0 = arith.constant 0 : i32
    %c0_i32_1 = arith.constant 0 : i32
    return %c0_i32, %c0_i32_0 : i32, i32
  }
  func.func @transform_2(%arg0: i32) -> (i32, i32) {
    %c0_i32 = arith.constant 0 : i32
    %c0_i32_0 = arith.constant 0 : i32
    %c0_i32_1 = arith.constant 0 : i32
    return %c0_i32, %c0_i32_0 : i32, i32
  }
  func.func @transform_3(%arg0: i32) -> (i32, i32) {
    %c0_i32 = arith.constant 0 : i32
    %c0_i32_0 = arith.constant 0 : i32
    %c0_i32_1 = arith.constant 0 : i32
    return %c0_i32, %c0_i32_0 : i32, i32
  }
  func.func @transform_4(%arg0: i32) -> (i32, i32) {
    %c0_i32 = arith.constant 0 : i32
    %c0_i32_0 = arith.constant 0 : i32
    %c0_i32_1 = arith.constant 0 : i32
    return %c0_i32, %c0_i32_0 : i32, i32
  }
  func.func @transform_5(%arg0: i32) -> (i32, i32) {
    %c0_i32 = arith.constant 0 : i32
    %c0_i32_0 = arith.constant 0 : i32
    return %arg0, %c0_i32 : i32, i32
  }
}

</mosaic_0001>

<bundles_post_ra>
// kernel: tpu_custom_call.1
= control target key start
LH: loop header
LB: loop body
LE: loop exit
PB: predicated region body
PF: predicated region fallthrough
CT: control target
= control target key end

     0   :  { %10 = vsyncpa [#allocation3], 0  ;;  %s388_s0 = inlined_call_operand.hbm [shape: f32[16,128], index: 0, kind: input, shape index: {}]   ;;  %s389_s1 = inlined_call_operand.hbm [shape: f32[128,128], index: 1, kind: input, shape index: {}]   ;;  %s390_s2 = inlined_call_operand.vmem [shape: f32[1,128], index: 2, kind: input, shape index: {}]   ;;  %s391_s3 = inlined_call_operand.hbm [shape: f32[128,128], index: 3, kind: input, shape index: {}]   ;;  %s392_s4 = inlined_call_operand.vmem [shape: f32[1,128], index: 4, kind: input, shape index: {}]   ;;  %s393_s5 = inlined_call_operand.hbm [shape: f32[16,128], index: 5, kind: output, shape index: {}]  }
   0x1   :  { %11 = vsyncpa [#allocation6], 0 }
   0x2   :  { %12 = vsyncpa [#allocation4], 0  ;;  %s30_s20 = sshll.u32 %s389_s1, 4  ;;  %s322_s21 = smov [#allocation5]   ;;  %s31_s20 = int_to_ptr.hbm [resolvable:$true] %s30_s20 }
   0x3   :  { %s32_s22 = sshll.u32 %s322_s21, 4  ;;  %s17_s25 = sshll.u32 %s388_s0, 4  ;;  %s33_s22 = int_to_ptr.vmem [resolvable:$true] %s32_s22  ;;  %s18_s25 = int_to_ptr.hbm [resolvable:$true] %s17_s25 }
   0x4   :  { %s323_s26 = smov 128   ;;  %s324_s27 = smov 8  }
   0x5   :  { %38 = dma.hbm_to_vmem [thread:$0]  %s31_s20, 2048, %s33_s22, [#allocation6], %s323_s26, %s323_s26, %s324_s27  }
   0x6   :  { %s325_s28 = smov [#allocation2]   ;;  %s45_s1 = sshll.u32 %s391_s3, 4  ;;  %s46_s1 = int_to_ptr.hbm [resolvable:$true] %s45_s1 }
   0x7   :  { %s19_s29 = sshll.u32 %s325_s28, 4  ;;  %s326_s0 = smov [#allocation7]   ;;  %s20_s29 = int_to_ptr.vmem [resolvable:$true] %s19_s29 }
   0x8   :  { %25 = dma.hbm_to_vmem [thread:$0]  %s18_s25, 256, %s20_s29, [#allocation3], %s323_s26, %s323_s26, %s324_s27  }
   0x9   :  { %s47_s7 = sshll.u32 %s326_s0, 4  ;;  %s48_s7 = int_to_ptr.vmem [resolvable:$true] %s47_s7 }
   0xa   :  { %53 = dma.hbm_to_vmem [thread:$0]  %s46_s1, 2048, %s48_s7, [#allocation6], %s323_s26, %s323_s26, %s324_s27  }
   0xb   :  { %316 = dma.done.wait [#allocation3], 256  }
   0xc   :  { %317 = vsyncadd [#allocation3], 4294967040 }
   0xd   :  { %318 = dma.done.wait [#allocation6], 4096  }
   0xe   :  { %319 = vsyncadd [#allocation6], 4294963200  ;;  %v85_v0 = vld [vmem:[#allocation5 + $0x78] sm:$0xff]  ;;  %v84_v1 = vld [vmem:[#allocation5 + $0x70] sm:$0xff]  ;;  %s327_s11 = smov [#allocation8]  }
   0xf   :  { %180 = vmatpush.msra.mxu2 %v85_v0  ;;  %90 = vmatpush.msra.mxu0 %v85_v0  ;;  %v83_v2 = vld [vmem:[#allocation5 + $0x68] sm:$0xff]  ;;  %v82_v3 = vld [vmem:[#allocation5 + $0x60] sm:$0xff]  ;;  %v81_v4 = vld [vmem:[#allocation5 + $0x58] sm:$0xff]  ;;  %s164_s12 = sshll.u32 %s327_s11, 4  ;;  %s165_s12 = int_to_ptr.vmem [resolvable:$true] %s164_s12 }
  0x10   :  { %v130_v5 = vld [vmem:[#allocation7 + $0x78] sm:$0xff]  ;;  %v129_v6 = vld [vmem:[#allocation7 + $0x70] sm:$0xff]  ;;  %v128_v8 = vld [vmem:[#allocation7 + $0x68] sm:$0xff] }
  0x11   :  { %181 = vmatpush.msra.mxu2 %v84_v1  ;;  %91 = vmatpush.msra.mxu0 %v84_v1  ;;  %v80_v7 = vld [vmem:[#allocation5 + $0x50] sm:$0xff]  ;;  %v79_v9 = vld [vmem:[#allocation5 + $0x48] sm:$0xff]  ;;  %v127_v10 = vld [vmem:[#allocation7 + $0x60] sm:$0xff] }
  0x12   :  { %196 = vmatpush.msra.mxu3 %v130_v5  ;;  %135 = vmatpush.msra.mxu1 %v130_v5  ;;  %v78_v11 = vld [vmem:[#allocation5 + $0x40] sm:$0xff]  ;;  %v126_v12 = vld [vmem:[#allocation7 + $0x58] sm:$0xff]  ;;  %v125_v14 = vld [vmem:[#allocation7 + $0x50] sm:$0xff] }
  0x13   :  { %182 = vmatpush.msra.mxu2 %v83_v2  ;;  %92 = vmatpush.msra.mxu0 %v83_v2  ;;  %v77_v13 = vld [vmem:[#allocation5 + $0x38] sm:$0xff]  ;;  %v76_v15 = vld [vmem:[#allocation5 + $0x30] sm:$0xff]  ;;  %v124_v16 = vld [vmem:[#allocation7 + $0x48] sm:$0xff] }
  0x14   :  { %197 = vmatpush.msra.mxu3 %v129_v6  ;;  %136 = vmatpush.msra.mxu1 %v129_v6  ;;  %v75_v17 = vld [vmem:[#allocation5 + $0x28] sm:$0xff]  ;;  %v123_v18 = vld [vmem:[#allocation7 + $0x40] sm:$0xff]  ;;  %v122_v20 = vld [vmem:[#allocation7 + $0x38] sm:$0xff] }
  0x15   :  { %183 = vmatpush.msra.mxu2 %v82_v3  ;;  %93 = vmatpush.msra.mxu0 %v82_v3  ;;  %v74_v19 = vld [vmem:[#allocation5 + $0x20] sm:$0xff]  ;;  %v73_v21 = vld [vmem:[#allocation5 + $0x18] sm:$0xff]  ;;  %v121_v22 = vld [vmem:[#allocation7 + $0x30] sm:$0xff] }
  0x16   :  { %198 = vmatpush.msra.mxu3 %v128_v8  ;;  %137 = vmatpush.msra.mxu1 %v128_v8  ;;  %v72_v23 = vld [vmem:[#allocation5 + $0x10] sm:$0xff]  ;;  %v120_v24 = vld [vmem:[#allocation7 + $0x28] sm:$0xff]  ;;  %v119_v26 = vld [vmem:[#allocation7 + $0x20] sm:$0xff] }
  0x17   :  { %184 = vmatpush.msra.mxu2 %v81_v4  ;;  %94 = vmatpush.msra.mxu0 %v81_v4  ;;  %v71_v25 = vld [vmem:[#allocation5 + $0x8] sm:$0xff]  ;;  %v70_v27 = vld [vmem:[#allocation5] sm:$0xff]  ;;  %v69_v28 = vld [vmem:[#allocation2 + $0x8] sm:$0xff] }
  0x18   :  { %199 = vmatpush.msra.mxu3 %v127_v10  ;;  %138 = vmatpush.msra.mxu1 %v127_v10  ;;  %v68_v29 = vld [vmem:[#allocation2] sm:$0xff]  ;;  %v118_v30 = vld [vmem:[#allocation7 + $0x18] sm:$0xff]  ;;  %v116_v32 = vld [vmem:[#allocation7 + $0x8] sm:$0xff] }
  0x19   :  { %185 = vmatpush.msra.mxu2 %v80_v7  ;;  %95 = vmatpush.msra.mxu0 %v80_v7  ;;  %v117_v31 = vld [vmem:[#allocation7 + $0x10] sm:$0xff]  ;;  %v115_v33 = vld [vmem:[#allocation7] sm:$0xff] }
  0x1a   :  { %200 = vmatpush.msra.mxu3 %v126_v12  ;;  %139 = vmatpush.msra.mxu1 %v126_v12  ;;  %v218_v34 = vld [vmem:[%s390_s2] ss:$0 sm:$0xff]  ;;  %s166_s2 = sshll.u32 %s393_s5, 4  ;;  %s167_s2 = int_to_ptr.hbm [resolvable:$true] %s166_s2 }
  0x1b   :  { %186 = vmatpush.msra.mxu2 %v79_v9  ;;  %96 = vmatpush.msra.mxu0 %v79_v9  ;;  %v219_v41 = vld [vmem:[%s392_s4] ss:$0 sm:$0xff] }
  0x1c   :  { %201 = vmatpush.msra.mxu3 %v125_v14  ;;  %140 = vmatpush.msra.mxu1 %v125_v14 }
  0x1d   :  { %187 = vmatpush.msra.mxu2 %v78_v11  ;;  %97 = vmatpush.msra.mxu0 %v78_v11 }
  0x1e   :  { %202 = vmatpush.msra.mxu3 %v124_v16  ;;  %141 = vmatpush.msra.mxu1 %v124_v16 }
  0x1f   :  { %188 = vmatpush.msra.mxu2 %v77_v13  ;;  %98 = vmatpush.msra.mxu0 %v77_v13 }
  0x20   :  { %203 = vmatpush.msra.mxu3 %v123_v18  ;;  %142 = vmatpush.msra.mxu1 %v123_v18 }
  0x21   :  { %189 = vmatpush.msra.mxu2 %v76_v15  ;;  %99 = vmatpush.msra.mxu0 %v76_v15 }
  0x22   :  { %204 = vmatpush.msra.mxu3 %v122_v20  ;;  %143 = vmatpush.msra.mxu1 %v122_v20 }
  0x23   :  { %190 = vmatpush.msra.mxu2 %v75_v17  ;;  %100 = vmatpush.msra.mxu0 %v75_v17 }
  0x24   :  { %205 = vmatpush.msra.mxu3 %v121_v22  ;;  %144 = vmatpush.msra.mxu1 %v121_v22 }
  0x25   :  { %191 = vmatpush.msra.mxu2 %v74_v19  ;;  %101 = vmatpush.msra.mxu0 %v74_v19 }
  0x26   :  { %206 = vmatpush.msra.mxu3 %v120_v24  ;;  %145 = vmatpush.msra.mxu1 %v120_v24 }
  0x27   :  { %192 = vmatpush.msra.mxu2 %v73_v21  ;;  %102 = vmatpush.msra.mxu0 %v73_v21 }
  0x28   :  { %207 = vmatpush.msra.mxu3 %v119_v26  ;;  %146 = vmatpush.msra.mxu1 %v119_v26 }
  0x29   :  { %193 = vmatpush.msra.mxu2 %v72_v23  ;;  %103 = vmatpush.msra.mxu0 %v72_v23 }
  0x2a   :  { %208 = vmatpush.msra.mxu3 %v118_v30  ;;  %147 = vmatpush.msra.mxu1 %v118_v30 }
  0x2b   :  { %194 = vmatpush.msra.mxu2 %v71_v25  ;;  %104 = vmatpush.msra.mxu0 %v71_v25 }
  0x2c   :  { %209 = vmatpush.msra.mxu3 %v117_v31  ;;  %148 = vmatpush.msra.mxu1 %v117_v31 }
  0x2d   :  { %195 = vmatpush.msra.mxu2 %v70_v27  ;;  %105 = vmatpush.msra.mxu0 %v70_v27 }
  0x2e   :  { %109 = vmatmul.f32.vlgmr.msra.gmra.mxu2 %v69_v28  ;;  %106 = vmatmul.f32.vlgmr.msra.gmra.mxu0 %v68_v29 }
  0x2f   :  { %210 = vmatpush.msra.mxu3 %v116_v32  ;;  %149 = vmatpush.msra.mxu1 %v116_v32 }
  0x31   :  { %211 = vmatpush.msra.mxu3 %v115_v33  ;;  %150 = vmatpush.msra.mxu1 %v115_v33 }
  0xab   :  { %v107_v35 = vpop.f32.mrf.mxu0 }
  0xac   :  { %v108_v36 = vadd.f32 %v218_v34, %v107_v35 }
  0xae   :  { %v113_v37 = vmax.f32 %v108_v36, 0.0 }
  0xb0   :  { %151 = vmatmul.f32.vlgmr.msra.gmra.mxu1 %v113_v37 }
  0xb1   :  { %v110_v38 = vpop.f32.mrf.mxu2 }
  0xb2   :  { %v111_v39 = vadd.f32 %v218_v34, %v110_v38 }
  0xb4   :  { %v114_v40 = vmax.f32 %v111_v39, 0.0 }
  0xb6   :  { %154 = vmatmul.f32.vlgmr.msra.gmra.mxu3 %v114_v40 }
 0x12d   :  { %v152_v42 = vpop.f32.mrf.mxu1 }
 0x12e   :  { %v153_v43 = vadd.f32 %v219_v41, %v152_v42 }
 0x130   :  { %158 = vst [vmem:[#allocation8] sm:$0xff] %v153_v43 }
 0x139   :  { %v155_v44 = vpop.f32.mrf.mxu3 }
 0x13a   :  { %v156_v45 = vadd.f32 %v219_v41, %v155_v44 }
 0x13c   :  { %159 = vst [vmem:[#allocation8 + $0x8] sm:$0xff] %v156_v45 }
 0x13d   :  { %172 = dma.vmem_to_hbm [thread:$0]  %s165_s12, 256, %s167_s2, [#allocation4], %s323_s26, %s323_s26, %s324_s27  }
 0x13e   :  { %320 = dma.done.wait [#allocation4], 256  }
 0x13f   :  { %321 = vsyncadd [#allocation4], 4294967040 }
 0x140   :  { %177 = vsyncpa [#allocation3], 1 }
 0x141   :  { %178 = vsyncpa [#allocation6], 1 }
 0x142   :  { %179 = vsyncpa [#allocation4], 1 }

</bundles_post_ra>
